<compile_context>
chip_gen: v7x
topology: tpu7x:2x2x1
jax: 0.10.0
libtpu: 0.0.40
codegen_flags: <defaults>
</compile_context>

<pallas_src>
import jax
import jax.numpy as jnp
from jax.experimental import pallas as pl
from jax.experimental.pallas import tpu as pltpu

HIDDEN = 64


def _round_up(n, m):
    return ((n + m - 1) // m) * m


def actor_kernel(x_ref, w1_ref, b1_ref, w2_ref, b2_ref, w3_ref, b3_ref, o_ref):
    cd = w1_ref.dtype  # compute (matmul-input) dtype, e.g. bf16
    # fc1 + relu  (bf16 x bf16 -> f32 accumulate on the MXU)
    h1 = jnp.dot(x_ref[...], w1_ref[...], preferred_element_type=jnp.float32)
    h1 = jnp.maximum(h1 + b1_ref[...], 0.0)
    # fc2 + relu
    h2 = jnp.dot(h1.astype(cd), w2_ref[...], preferred_element_type=jnp.float32)
    h2 = jnp.maximum(h2 + b2_ref[...], 0.0)
    # fc3 + tanh (bias add + tanh in f32)
    h3 = jnp.dot(h2.astype(cd), w3_ref[...], preferred_element_type=jnp.float32)
    o_ref[...] = jnp.tanh(h3 + b3_ref[...]).astype(o_ref.dtype)


def actor_forward(x, params, *, batch_tile=512, compute_dtype=jnp.bfloat16):
    """x: (B, nb_status) float32. params: transposed weights (in,out) + (1,out) biases."""
    w1, b1 = params["w1"], params["b1"]
    w2, b2 = params["w2"], params["b2"]
    w3, b3 = params["w3"], params["b3"]
    B, nb_status = x.shape
    nb_actions = w3.shape[1]

    # Batch tile: multiple of 8 (sublane), capped at batch_tile rows.
    TB = min(batch_tile, _round_up(B, 8))
    B_pad = _round_up(B, TB)

    x_c = x.astype(compute_dtype)
    if B_pad != B:
        x_c = jnp.pad(x_c, ((0, B_pad - B), (0, 0)))
    w1_c, w2_c, w3_c = (w.astype(compute_dtype) for w in (w1, w2, w3))
    b1_f, b2_f, b3_f = (b.astype(jnp.float32) for b in (b1, b2, b3))

    def resident(shape):
        # Constant block index -> weight/bias stays VMEM-resident across grid steps.
        return pl.BlockSpec(shape, lambda i: (0, 0))

    dtype_bytes = jnp.dtype(compute_dtype).itemsize
    weight_elems = nb_status * HIDDEN + HIDDEN * HIDDEN + HIDDEN * nb_actions
    flops = 2 * B_pad * weight_elems
    bytes_accessed = (
        B_pad * nb_status * dtype_bytes          # streamed input
        + B_pad * nb_actions * 4                 # streamed f32 output
        + weight_elems * dtype_bytes             # resident weights (DMA'd once)
        + (2 * HIDDEN + nb_actions) * 4          # biases
    )

    out = pl.pallas_call(
        actor_kernel,
        out_shape=jax.ShapeDtypeStruct((B_pad, nb_actions), jnp.float32),
        grid=(B_pad // TB,),
        in_specs=[
            pl.BlockSpec((TB, nb_status), lambda i: (i, 0)),
            resident((nb_status, HIDDEN)),
            resident((1, HIDDEN)),
            resident((HIDDEN, HIDDEN)),
            resident((1, HIDDEN)),
            resident((HIDDEN, nb_actions)),
            resident((1, nb_actions)),
        ],
        out_specs=pl.BlockSpec((TB, nb_actions), lambda i: (i, 0)),
        compiler_params=pltpu.CompilerParams(
            dimension_semantics=("parallel",),
        ),
        cost_estimate=pl.CostEstimate(
            flops=flops,
            transcendentals=B_pad * nb_actions,
            bytes_accessed=bytes_accessed,
        ),
    )(x_c, w1_c, b1_f, w2_c, b2_f, w3_c, b3_f)

    return out[:B] if B_pad != B else out


def init_actor_params(key, nb_status, nb_actions, init_w=0.003):
    """Deterministic init mirroring nn.Linear defaults + the fc3 weight override."""
    k = jax.random.split(key, 6)

    def lin_init(kw, kb, fan_in, fan_out):
        bound = 1.0 / jnp.sqrt(jnp.float32(fan_in))
        w = jax.random.uniform(kw, (fan_in, fan_out), jnp.float32, -bound, bound)
        b = jax.random.uniform(kb, (1, fan_out), jnp.float32, -bound, bound)
        return w, b

    w1, b1 = lin_init(k[0], k[1], nb_status, HIDDEN)
    w2, b2 = lin_init(k[2], k[3], HIDDEN, HIDDEN)
    # fc3: weight overridden to uniform(-init_w, init_w); bias keeps default init.
    w3 = jax.random.uniform(k[4], (HIDDEN, nb_actions), jnp.float32, -init_w, init_w)
    b3_bound = 1.0 / jnp.sqrt(jnp.float32(HIDDEN))
    b3 = jax.random.uniform(k[5], (1, nb_actions), jnp.float32, -b3_bound, b3_bound)
    return {"w1": w1, "b1": b1, "w2": w2, "b2": b2, "w3": w3, "b3": b3}


def actor_reference_mixed(x, p, compute_dtype=jnp.bfloat16):
    """Pure-JAX reference with the same bf16-operand / f32-accumulate recipe."""
    cd = compute_dtype
    h1 = jnp.dot(x.astype(cd), p["w1"].astype(cd), preferred_element_type=jnp.float32)
    h1 = jnp.maximum(h1 + p["b1"], 0.0)
    h2 = jnp.dot(h1.astype(cd), p["w2"].astype(cd), preferred_element_type=jnp.float32)
    h2 = jnp.maximum(h2 + p["b2"], 0.0)
    h3 = jnp.dot(h2.astype(cd), p["w3"].astype(cd), preferred_element_type=jnp.float32)
    return jnp.tanh(h3 + p["b3"])


def actor_reference_f32(x, p):
    h1 = jnp.maximum(x @ p["w1"] + p["b1"], 0.0)
    h2 = jnp.maximum(h1 @ p["w2"] + p["b2"], 0.0)
    return jnp.tanh(h2 @ p["w3"] + p["b3"])


if __name__ == "__main__":
    key = jax.random.PRNGKey(0)
    kx, kx_big, kp = jax.random.split(key, 3)

    nb_status, nb_actions = 32, 8
    params = init_actor_params(kp, nb_status, nb_actions, init_w=0.003)

    # Small batch (single grid step, TB == B).
    x_small = jax.random.normal(kx, (8, nb_status), jnp.float32)
    out_small = jax.block_until_ready(actor_forward(x_small, params))
    assert out_small.shape == (8, nb_actions)
    ref_small = actor_reference_mixed(x_small, params)
    assert jnp.allclose(out_small, ref_small, atol=1e-3, rtol=1e-3)
    # Sanity vs full-f32 reference (bf16 operands -> loose tolerance).
    assert jnp.allclose(out_small, actor_reference_f32(x_small, params), atol=3e-2, rtol=3e-2)

    # Larger, non-multiple batch: exercises the batch grid, resident weights,
    # padding, and the parallel dimension semantics.
    x_big = jax.random.normal(kx_big, (1000, nb_status), jnp.float32)
    out_big = jax.block_until_ready(actor_forward(x_big, params, batch_tile=512))
    assert out_big.shape == (1000, nb_actions)
    ref_big = actor_reference_mixed(x_big, params)
    assert jnp.allclose(out_big, ref_big, atol=1e-3, rtol=1e-3)

    print("KERNEL_OK")
</pallas_src>

<mosaic_0001>
module attributes {stable_mosaic.version = 11 : i64} {
  func.func @actor_kernel(%arg0: i32, %arg1: memref<8x32xbf16, #tpu.memory_space<vmem>>, %arg2: memref<32x64xbf16, #tpu.memory_space<vmem>>, %arg3: memref<1x64xf32, #tpu.memory_space<vmem>>, %arg4: memref<64x64xbf16, #tpu.memory_space<vmem>>, %arg5: memref<1x64xf32, #tpu.memory_space<vmem>>, %arg6: memref<64x8xbf16, #tpu.memory_space<vmem>>, %arg7: memref<1x8xf32, #tpu.memory_space<vmem>>, %arg8: memref<8x8xf32, #tpu.memory_space<vmem>>) attributes {dimension_semantics = [#tpu.dimension_semantics<parallel>], iteration_bounds = array<i64: 1>, scalar_prefetch = 0 : i64, scratch_operands = 0 : i64, tpu.core_type = #tpu.core_type<tc>, window_params = [{transform_indices = @transform_0, window_bounds = array<i64: 8, 32>}, {pipeline_mode = #tpu.pipeline_mode<synchronous>, transform_indices = @transform_1, window_bounds = array<i64: 32, 64>}, {pipeline_mode = #tpu.pipeline_mode<synchronous>, transform_indices = @transform_2, window_bounds = array<i64: 1, 64>}, {pipeline_mode = #tpu.pipeline_mode<synchronous>, transform_indices = @transform_3, window_bounds = array<i64: 64, 64>}, {pipeline_mode = #tpu.pipeline_mode<synchronous>, transform_indices = @transform_4, window_bounds = array<i64: 1, 64>}, {pipeline_mode = #tpu.pipeline_mode<synchronous>, transform_indices = @transform_5, window_bounds = array<i64: 64, 8>}, {pipeline_mode = #tpu.pipeline_mode<synchronous>, transform_indices = @transform_6, window_bounds = array<i64: 1, 8>}, {transform_indices = @transform_7, window_bounds = array<i64: 8, 8>}]} {
    %c0 = arith.constant 0 : index
    %c0_0 = arith.constant 0 : index
    %0 = vector.load %arg1[%c0, %c0_0] : memref<8x32xbf16, #tpu.memory_space<vmem>>, vector<8x32xbf16>
    %c0_1 = arith.constant 0 : index
    %c0_2 = arith.constant 0 : index
    %1 = vector.load %arg2[%c0_1, %c0_2] : memref<32x64xbf16, #tpu.memory_space<vmem>>, vector<32x64xbf16>
    %cst = arith.constant dense<0.000000e+00> : vector<8x64xf32>
    %2 = tpu.matmul %0, %1, %cst {dimension_numbers = #tpu.dot_dimension_numbers<[1], [0], [0], [1], [0, 0, 1, 1], [], []>} : vector<8x32xbf16>, vector<32x64xbf16>, vector<8x64xf32> -> vector<8x64xf32>
    %c0_3 = arith.constant 0 : index
    %c0_4 = arith.constant 0 : index
    %3 = vector.load %arg3[%c0_3, %c0_4] : memref<1x64xf32, #tpu.memory_space<vmem>>, vector<1x64xf32>
    %4 = vector.broadcast %3 : vector<1x64xf32> to vector<8x64xf32>
    %5 = arith.addf %2, %4 : vector<8x64xf32>
    %cst_5 = arith.constant 0.000000e+00 : f32
    %6 = vector.broadcast %cst_5 : f32 to vector<8x64xf32>
    %7 = arith.maximumf %5, %6 : vector<8x64xf32>
    %8 = arith.truncf %7 : vector<8x64xf32> to vector<8x64xbf16>
    %c0_6 = arith.constant 0 : index
    %c0_7 = arith.constant 0 : index
    %9 = vector.load %arg4[%c0_6, %c0_7] : memref<64x64xbf16, #tpu.memory_space<vmem>>, vector<64x64xbf16>
    %cst_8 = arith.constant dense<0.000000e+00> : vector<8x64xf32>
    %10 = tpu.matmul %8, %9, %cst_8 {dimension_numbers = #tpu.dot_dimension_numbers<[1], [0], [0], [1], [0, 0, 1, 1], [], []>} : vector<8x64xbf16>, vector<64x64xbf16>, vector<8x64xf32> -> vector<8x64xf32>
    %c0_9 = arith.constant 0 : index
    %c0_10 = arith.constant 0 : index
    %11 = vector.load %arg5[%c0_9, %c0_10] : memref<1x64xf32, #tpu.memory_space<vmem>>, vector<1x64xf32>
    %12 = vector.broadcast %11 : vector<1x64xf32> to vector<8x64xf32>
    %13 = arith.addf %10, %12 : vector<8x64xf32>
    %cst_11 = arith.constant 0.000000e+00 : f32
    %14 = vector.broadcast %cst_11 : f32 to vector<8x64xf32>
    %15 = arith.maximumf %13, %14 : vector<8x64xf32>
    %16 = arith.truncf %15 : vector<8x64xf32> to vector<8x64xbf16>
    %c0_12 = arith.constant 0 : index
    %c0_13 = arith.constant 0 : index
    %17 = vector.load %arg6[%c0_12, %c0_13] : memref<64x8xbf16, #tpu.memory_space<vmem>>, vector<64x8xbf16>
    %cst_14 = arith.constant dense<0.000000e+00> : vector<8x8xf32>
    %18 = tpu.matmul %16, %17, %cst_14 {dimension_numbers = #tpu.dot_dimension_numbers<[1], [0], [0], [1], [0, 0, 1, 1], [], []>} : vector<8x64xbf16>, vector<64x8xbf16>, vector<8x8xf32> -> vector<8x8xf32>
    %c0_15 = arith.constant 0 : index
    %c0_16 = arith.constant 0 : index
    %19 = vector.load %arg7[%c0_15, %c0_16] : memref<1x8xf32, #tpu.memory_space<vmem>>, vector<1x8xf32>
    %20 = vector.broadcast %19 : vector<1x8xf32> to vector<8x8xf32>
    %21 = arith.addf %18, %20 : vector<8x8xf32>
    %22 = math.tanh %21 : vector<8x8xf32>
    %c0_17 = arith.constant 0 : index
    %c0_18 = arith.constant 0 : index
    %23 = vector.load %arg8[%c0_17, %c0_18] : memref<8x8xf32, #tpu.memory_space<vmem>>, vector<8x8xf32>
    tpu.vector_store %arg8[%c0_17, %c0_18], %22 {strides = array<i32>} : memref<8x8xf32, #tpu.memory_space<vmem>>, vector<8x8xf32>,
    return
  }
  func.func @transform_0(%arg0: i32) -> (i32, i32) {
    %c0_i32 = arith.constant 0 : i32
    %c0_i32_0 = arith.constant 0 : i32
    return %arg0, %c0_i32 : i32, i32
  }
  func.func @transform_1(%arg0: i32) -> (i32, i32) {
    %c0_i32 = arith.constant 0 : i32
    %c0_i32_0 = arith.constant 0 : i32
    %c0_i32_1 = arith.constant 0 : i32
    return %c0_i32, %c0_i32_0 : i32, i32
  }
  func.func @transform_2(%arg0: i32) -> (i32, i32) {
    %c0_i32 = arith.constant 0 : i32
    %c0_i32_0 = arith.constant 0 : i32
    %c0_i32_1 = arith.constant 0 : i32
    return %c0_i32, %c0_i32_0 : i32, i32
  }
  func.func @transform_3(%arg0: i32) -> (i32, i32) {
    %c0_i32 = arith.constant 0 : i32
    %c0_i32_0 = arith.constant 0 : i32
    %c0_i32_1 = arith.constant 0 : i32
    return %c0_i32, %c0_i32_0 : i32, i32
  }
  func.func @transform_4(%arg0: i32) -> (i32, i32) {
    %c0_i32 = arith.constant 0 : i32
    %c0_i32_0 = arith.constant 0 : i32
    %c0_i32_1 = arith.constant 0 : i32
    return %c0_i32, %c0_i32_0 : i32, i32
  }
  func.func @transform_5(%arg0: i32) -> (i32, i32) {
    %c0_i32 = arith.constant 0 : i32
    %c0_i32_0 = arith.constant 0 : i32
    %c0_i32_1 = arith.constant 0 : i32
    return %c0_i32, %c0_i32_0 : i32, i32
  }
  func.func @transform_6(%arg0: i32) -> (i32, i32) {
    %c0_i32 = arith.constant 0 : i32
    %c0_i32_0 = arith.constant 0 : i32
    %c0_i32_1 = arith.constant 0 : i32
    return %c0_i32, %c0_i32_0 : i32, i32
  }
  func.func @transform_7(%arg0: i32) -> (i32, i32) {
    %c0_i32 = arith.constant 0 : i32
    %c0_i32_0 = arith.constant 0 : i32
    return %arg0, %c0_i32 : i32, i32
  }
}

</mosaic_0001>

<bundles_post_ra>
// kernel: tpu_custom_call.1
= control target key start
LH: loop header
LB: loop body
LE: loop exit
PB: predicated region body
PF: predicated region fallthrough
CT: control target
= control target key end

     0   :  { %12 = vsyncpa [#allocation3], 0  ;;  %s535_s0 = inlined_call_operand.vmem [shape: bf16[8,32], index: 0, kind: input, shape index: {}]   ;;  %s536_s1 = inlined_call_operand.hbm [shape: bf16[32,64], index: 1, kind: input, shape index: {}]   ;;  %s537_s2 = inlined_call_operand.vmem [shape: f32[1,64], index: 2, kind: input, shape index: {}]   ;;  %s538_s3 = inlined_call_operand.vmem [shape: bf16[64,64], index: 3, kind: input, shape index: {}]   ;;  %s539_s4 = inlined_call_operand.vmem [shape: f32[1,64], index: 4, kind: input, shape index: {}]   ;;  %s540_s5 = inlined_call_operand.vmem [shape: bf16[64,8], index: 5, kind: input, shape index: {}]   ;;  %s541_s6 = inlined_call_operand.vmem [shape: f32[1,8], index: 6, kind: input, shape index: {}]   ;;  %s542_s7 = inlined_call_operand.hbm [shape: f32[8,8], index: 7, kind: output, shape index: {}]  }
   0x1   :  { %13 = vsyncpa [#allocation4], 0  ;;  %s424_s24 = smov [#allocation2]   ;;  %s376_s28 = scalar_lea.hbm %s536_s1, 256 }
   0x2   :  { %s21_s25 = sshll.u32 %s424_s24, 4  ;;  %p377_p0 = scmp.ne.s32.totalorder %s536_s1, %s376_s28  ;;  %s22_s25 = int_to_ptr.vmem [resolvable:$true] %s21_s25 }
   0x3   :  { %p380_p1 = scmp.lt.u32.totalorder %s376_s28, %s536_s1 }
   0x5   :  { %p382_p2 = pnand %p380_p1, %p377_p0 }
   0x7   :  { %385 = shalt.err (!%p382_p2)
}
   0x8   :  { %s386_s10 = scalar_lea.vmem %s22_s25, 256  ;;  %p391_p4 = scmp.lt.s32.totalorder %s22_s25, %s22_s25 }
   0x9   :  { %p387_p3 = scmp.ne.s32.totalorder %s22_s25, %s386_s10  ;;  %p392_p5 = scmp.lt.s32.totalorder %s386_s10, %s386_s10 }
   0xb   :  { %p393_p6 = por %p392_p5, %p391_p4 }
   0xd   :  { %p394_p7 = pnand %p393_p6, %p387_p3 }
   0xf   :  { %397 = shalt.err (!%p394_p7)
}
  0x10   :  { %s425_s11 = smov 64   ;;  %s426_s12 = smov 4  }
  0x11   :  { %27 = dma.hbm_to_vmem [thread:$0]  %s536_s1, 256, %s22_s25, [#allocation3], %s425_s11, %s425_s11, %s426_s12  }
  0x12   :  { %420 = dma.done.wait [#allocation3], 256  }
  0x13   :  { %421 = vsyncadd [#allocation3], 4294967040  ;;  %v427_v0 = vmov 0.0   ;;  %vm428_vm0 = vmmov 0   ;;  %v364_v1 = vld [vmem:[#allocation2] sm:$0xff]   ;;  %v365_v2 = vld [vmem:[#allocation2 + $0x8] sm:$0xff]  }
  0x14   :  { %326 = vmatprep.subr.bf16.mxu0 %v427_v0  ;;  %330 = vmatprep.mubr.msk.bf16.mxu0 %vm428_vm0, %v427_v0  ;;  %v366_v3 = vld [vmem:[%s538_s3] sm:$0xff]   ;;  %vm66_vm1 = vcmask 261120   ;;  %v367_v5 = vld [vmem:[%s538_s3 + $0x8] sm:$0xff]   ;;  %v368_v6 = vld [vmem:[%s538_s3 + $0x10] sm:$0xff]   ;;  %vm151_vm2 = vcmask 523264   ;;  %vm280_vm3 = vcmask 64512  }
  0x15   :  { %334 = vmatprep.subr.bf16.mxu1 %v427_v0  ;;  %342 = vmatprep.mubr.msk.bf16.mxu1 %vm428_vm0, %v427_v0  ;;  %v42_v4 = vld [vmem:[%s535_s0] sm:$0xf]  ;;  %v369_v7 = vld [vmem:[%s538_s3 + $0x18] sm:$0xff]   ;;  %v371_v9 = vld [vmem:[%s540_s5 + $0x8] sm:$0xff]  }
  0x16   :  { %327 = vmatpush3.bf16.msra.mxu0 %v364_v1  ;;  %335 = vmatpush3.bf16.msra.mxu1 %v366_v3  ;;  %v370_v8 = vld [vmem:[%s540_s5] sm:$0xff]   ;;  %v372_v18 = vld [vmem:[%s540_s5 + $0x10] sm:$0xff]   ;;  %v373_v19 = vld [vmem:[%s540_s5 + $0x18] sm:$0xff]  }
  0x17   :  { %328 = vmatprep.subr.bf16.mxu0 %v427_v0  ;;  %336 = vmatprep.subr.bf16.mxu1 %v427_v0  ;;  %v297_v10 = vld [vmem:[%s537_s2] ss:$0 sm:$0xff] }
  0x18   :  { %v301_v20 = vld [vmem:[%s539_s4] ss:$0 sm:$0xff]  ;;  %s429_s4 = smov [#allocation5]  }
  0x19   :  { %v307_v28 = vld [vmem:[%s541_s6] ss:$0 sm:$0xff]  ;;  %s288_s5 = sshll.u32 %s429_s4, 4  ;;  %s289_s5 = int_to_ptr.vmem [resolvable:$true] %s288_s5 }
  0x1a   :  { %329 = vmatpush3.bf16.msra.mxu0 %v365_v2  ;;  %337 = vmatpush3.bf16.msra.mxu1 %v367_v5  ;;  %s398_s12 = scalar_lea.vmem %s289_s5, 128  ;;  %p403_p9 = scmp.lt.s32.totalorder %s289_s5, %s289_s5 }
  0x1b   :  { %346 = vmatprep.subr.bf16.mxu0 %v427_v0  ;;  %338 = vmatprep.subr.bf16.mxu1 %v427_v0  ;;  %p399_p8 = scmp.ne.s32.totalorder %s289_s5, %s398_s12  ;;  %p404_p10 = scmp.lt.s32.totalorder %s398_s12, %s398_s12 }
  0x1d   :  { %331 = vmatmul.mubr.msk.bf16.vlgmr.msra.gmra.mrb[0].mxu0 %vm66_vm1, %v42_v4  ;;  %p405_p11 = por %p404_p10, %p403_p9 }
  0x1e   :  { %354 = vmatprep.mubr.msk.bf16.mxu0 %vm428_vm0, %v427_v0  ;;  %339 = vmatpush3.bf16.msra.mxu1 %v368_v6 }
  0x1f   :  { %340 = vmatprep.subr.bf16.mxu1 %v427_v0  ;;  %347 = vmatpush3.bf16.msra.mxu0 %v370_v8  ;;  %p406_p12 = pnand %p405_p11, %p399_p8 }
  0x20   :  { %348 = vmatprep.subr.bf16.mxu0 %v427_v0 }
  0x22   :  { %341 = vmatpush3.bf16.msra.mxu1 %v369_v7 }
  0x23   :  { %349 = vmatpush3.bf16.msra.mxu0 %v371_v9 }
  0x24   :  { %350 = vmatprep.subr.bf16.mxu0 %v427_v0 }
  0x27   :  { %351 = vmatpush3.bf16.msra.mxu0 %v372_v18 }
  0x28   :  { %352 = vmatprep.subr.bf16.mxu0 %v427_v0 }
  0x2b   :  { %353 = vmatpush3.bf16.msra.mxu0 %v373_v19 }
  0xf0   :  { %v104_v11 = vpop.f32.mrb[0].mxu0 }
  0xf1   :  { %v105_v12 = vadd.f32 %v297_v10, %v104_v11  ;;  %v332_v13 = vpop.f32.mrb[1].mxu0 }
  0xf2   :  { %v107_v14 = vpop.f32.mrb[2].mxu0 }
  0xf3   :  { %v110_v15 = vmax.f32 %v105_v12, 0.0  ;;  %v333_v16 = vpop.f32.mrb[3].mxu0 }
  0xf5   :  { %v111_v17 = vpack.c.bf16 %v110_v15, %v110_v15 }
  0xf7   :  { %343 = vmatmul.mubr.msk.bf16.vlgmr.msra.gmra.mrb[0].mxu1 %vm151_vm2, %v111_v17 }
 0x1ca   :  { %v189_v21 = vpop.f32.mrb[0].mxu1 }
 0x1cb   :  { %v190_v22 = vadd.f32 %v301_v20, %v189_v21  ;;  %v344_v23 = vpop.f32.mrb[1].mxu1 }
 0x1cc   :  { %v192_v24 = vpop.f32.mrb[2].mxu1 }
 0x1cd   :  { %v195_v25 = vmax.f32 %v190_v22, 0.0  ;;  %v345_v26 = vpop.f32.mrb[3].mxu1 }
 0x1cf   :  { %v196_v27 = vpack.c.bf16 %v195_v25, %v195_v25 }
 0x1d1   :  { %355 = vmatmul.mubr.msk.bf16.vlgmr.msra.gmra.mrb[4].mxu0 %vm151_vm2, %v196_v27 }
 0x2a4   :  { %v273_v29 = vpop.f32.mrb[4].mxu0 }
 0x2a5   :  { %v274_v30 = vadd.f32 %v307_v28, %v273_v29  ;;  %v356_v31 = vpop.f32.mrb[5].mxu0 }
 0x2a6   :  { %v276_v32 = vpop.f32.mrb[6].mxu0 }
 0x2a7   :  { %374 = vtanh.f32 %v274_v30  ;;  %v357_v33 = vpop.f32.mrb[7].mxu0 }
 0x2b1   :  { %v375_v34 = vpop.eup %374 }
 0x2b2   :  { %281 = vst.msk [vmem:[#allocation5] sm:$0xff] %vm280_vm3, %v375_v34 }
 0x2b3   :  { %409 = shalt.err (!%p406_p12)
}
 0x2b4   :  { %s410_s14 = scalar_lea.hbm %s542_s7, 128 }
 0x2b5   :  { %p411_p13 = scmp.ne.s32.totalorder %s542_s7, %s410_s14  ;;  %p414_p0 = scmp.lt.u32.totalorder %s410_s14, %s542_s7 }
 0x2b7   :  { %p416_p1 = pnand %p414_p0, %p411_p13 }
 0x2b9   :  { %419 = shalt.err (!%p416_p1)
}
 0x2ba   :  { %291 = dma.vmem_to_hbm [thread:$0]  %s289_s5, 128, %s542_s7, [#allocation4]  }
 0x2bb   :  { %422 = dma.done.wait [#allocation4], 128  }
 0x2bc   :  { %423 = vsyncadd [#allocation4], 4294967168 }
 0x2bd   :  { %295 = vsyncpa [#allocation3], 1 }
 0x2be   :  { %296 = vsyncpa [#allocation4], 1 }

</bundles_post_ra>
